<compile_context>
chip_gen: v7x
topology: tpu7x:2x2x1
jax: 0.10.0
libtpu: 0.0.40
codegen_flags: <defaults>
</compile_context>

<pallas_src>
import functools

import jax
import jax.numpy as jnp
from jax.experimental import pallas as pl
from jax.experimental.pallas import tpu as pltpu

_LANE = 128


def _clamp_kernel(x_ref, o_ref, *, min_val, max_val):
    x = x_ref[...]
    lo = jnp.asarray(min_val, dtype=x.dtype)
    hi = jnp.asarray(max_val, dtype=x.dtype)
    o_ref[...] = jnp.minimum(jnp.maximum(x, lo), hi)


def clamp_pallas(x: jax.Array, min_val: float = -1.0, max_val: float = 1.0,
                 *, block_rows: int = 8192,
                 min_pallas_elems: int = 16384) -> jax.Array:
    """Elementwise clamp of x to [min_val, max_val] via a Pallas TPU kernel."""
    orig_shape = x.shape
    dtype = x.dtype
    n = x.size

    # Tiny tensors: kernel-launch + single-block overhead dwarfs the work;
    # let XLA fuse a plain clip into neighboring ops.
    if n == 0 or n < min_pallas_elems:
        return jnp.clip(x, jnp.asarray(min_val, dtype), jnp.asarray(max_val, dtype))

    # Flatten to a lane-dense 2D slab. Pad only to a multiple of 128 (at most
    # 127 elements), never to a full block; the ragged row count is handled by
    # Pallas partial-block masking.
    x_flat = jnp.ravel(x)
    pad = (-n) % _LANE
    if pad:
        x_flat = jnp.pad(x_flat, (0, pad))
    rows = (n + pad) // _LANE
    x2d = x_flat.reshape(rows, _LANE)

    # block_rows default 8192 is a multiple of 32, so the block respects the
    # min sublane tile for f32/bf16/int8 alike. Small inputs get one
    # full-array block (always a legal block shape).
    tile_rows = block_rows if rows > block_rows else rows
    num_blocks = pl.cdiv(rows, tile_rows)

    block_bytes = tile_rows * _LANE * dtype.itemsize
    # 2 buffers x (input block + output block) + headroom; capped so it is
    # valid on v7x's 64 MiB VMEM as well as v5e/v6e's 128 MiB.
    vmem_limit = int(min(48 << 20, 4 * block_bytes + (8 << 20)))

    kernel = functools.partial(_clamp_kernel, min_val=min_val, max_val=max_val)

    out2d = pl.pallas_call(
        kernel,
        out_shape=jax.ShapeDtypeStruct((rows, _LANE), dtype),
        grid=(num_blocks,),
        in_specs=[pl.BlockSpec((tile_rows, _LANE), lambda i: (i, 0))],
        out_specs=pl.BlockSpec((tile_rows, _LANE), lambda i: (i, 0)),
        compiler_params=pltpu.CompilerParams(
            dimension_semantics=("parallel",),
            vmem_limit_bytes=vmem_limit,
        ),
        cost_estimate=pl.CostEstimate(
            flops=2 * n,
            transcendentals=0,
            bytes_accessed=2 * n * dtype.itemsize,
        ),
    )(x2d)

    out_flat = out2d.reshape(-1)
    if pad:
        out_flat = out_flat[:n]
    return out_flat.reshape(orig_shape)


if __name__ == "__main__":
    key = jax.random.PRNGKey(0)
    k1, k2, k3 = jax.random.split(key, 3)

    # 1) Small NCHW activation consistent with the module (bypass path:
    #    tiny tensors go straight to jnp.clip, which XLA fuses).
    x_small = jax.random.normal(k1, (2, 4, 16, 16), dtype=jnp.float32) * 3.0
    y_small = jax.block_until_ready(clamp_pallas(x_small, -1.0, 1.0))
    assert y_small.shape == x_small.shape and y_small.dtype == x_small.dtype
    assert jnp.allclose(y_small, jnp.clip(x_small, -1.0, 1.0))

    # 2) Larger activation exercising the Pallas path with a multi-block grid
    #    and a masked partial final block (block_rows=512 keeps the test small;
    #    production default is 8192 rows = 4 MiB f32 blocks).
    x_big = jax.random.normal(k2, (4, 16, 56, 56), dtype=jnp.float32) * 3.0
    y_big = jax.block_until_ready(clamp_pallas(x_big, -1.0, 1.0, block_rows=512))
    assert y_big.shape == x_big.shape and y_big.dtype == x_big.dtype
    assert jnp.allclose(y_big, jnp.clip(x_big, -1.0, 1.0))

    # 3) Ragged element count (not a multiple of 128): minimal lane pad +
    #    tail slice path, single full-array block.
    x_rag = jax.random.normal(k3, (3, 5, 33, 47), dtype=jnp.float32) * 3.0
    y_rag = jax.block_until_ready(clamp_pallas(x_rag, -1.0, 1.0))
    assert y_rag.shape == x_rag.shape and y_rag.dtype == x_rag.dtype
    assert jnp.allclose(y_rag, jnp.clip(x_rag, -1.0, 1.0))

    print("KERNEL_OK")
</pallas_src>

<mosaic_0001>
module attributes {stable_mosaic.version = 11 : i64} {
  func.func @_clamp_kernel(%arg0: i32, %arg1: memref<512x128xf32, #tpu.memory_space<vmem>>, %arg2: memref<512x128xf32, #tpu.memory_space<vmem>>) attributes {dimension_semantics = [#tpu.dimension_semantics<parallel>], iteration_bounds = array<i64: 4>, scalar_prefetch = 0 : i64, scratch_operands = 0 : i64, tpu.core_type = #tpu.core_type<tc>, window_params = [{transform_indices = @transform_0, window_bounds = array<i64: 512, 128>}, {transform_indices = @transform_1, window_bounds = array<i64: 512, 128>}]} {
    %c0 = arith.constant 0 : index
    %c0_0 = arith.constant 0 : index
    %0 = vector.load %arg1[%c0, %c0_0] : memref<512x128xf32, #tpu.memory_space<vmem>>, vector<512x128xf32>
    %cst = arith.constant -1.000000e+00 : f32
    %1 = vector.broadcast %cst : f32 to vector<512x128xf32>
    %2 = arith.maximumf %0, %1 : vector<512x128xf32>
    %cst_1 = arith.constant 1.000000e+00 : f32
    %3 = vector.broadcast %cst_1 : f32 to vector<512x128xf32>
    %4 = arith.minimumf %2, %3 : vector<512x128xf32>
    %c0_2 = arith.constant 0 : index
    %c0_3 = arith.constant 0 : index
    %5 = vector.load %arg2[%c0_2, %c0_3] : memref<512x128xf32, #tpu.memory_space<vmem>>, vector<512x128xf32>
    tpu.vector_store %arg2[%c0_2, %c0_3], %4 {strides = array<i32>} : memref<512x128xf32, #tpu.memory_space<vmem>>, vector<512x128xf32>,
    return
  }
  func.func @transform_0(%arg0: i32) -> (i32, i32) {
    %c0_i32 = arith.constant 0 : i32
    %c0_i32_0 = arith.constant 0 : i32
    return %arg0, %c0_i32 : i32, i32
  }
  func.func @transform_1(%arg0: i32) -> (i32, i32) {
    %c0_i32 = arith.constant 0 : i32
    %c0_i32_0 = arith.constant 0 : i32
    return %arg0, %c0_i32 : i32, i32
  }
}

</mosaic_0001>

<bundles_post_ra>
// kernel: tpu_custom_call.1
= control target key start
LH: loop header
LB: loop body
LE: loop exit
PB: predicated region body
PF: predicated region fallthrough
CT: control target
= control target key end

     0   :  { %6 = vsyncpa [#allocation3], 0  ;;  %s1043_s0 = inlined_call_operand.hbm [shape: f32[1568,128], index: 0, kind: input, shape index: {}]   ;;  %s1044_s1 = inlined_call_operand.hbm [shape: f32[1568,128], index: 1, kind: output, shape index: {}]  }
   0x1   :  { %8 = vsyncpa [#allocation3 + $0x1], 0 }
   0x2   :  { %9 = vsyncpa [#allocation4], 0 }
   0x3   :  { %11 = vsyncpa [#allocation4 + $0x1], 0  ;;  %s743_s6 = smov 0   ;;  %s745_s7 = smov 0  }
   0x4   :  { %s747_s8 = smov 0   ;;  %s749_s9 = smov 0  }
   0x5 LB: > { %s764_s10 = sadd.s32 4294967295, %s725_s9   ;;  %s500_s11 = sadd.s32 4294967294, %s725_s9   ;;  %s725_s9 = sphi %s749_s9, %s1052_s9   ;;  %s721_s8 = sphi %s747_s8, %s1051_s8   ;;  %s717_s7 = sphi %s745_s7, %s1050_s7   ;;  %s713_s6 = sphi %s743_s6, %s1049_s6  }
   0x6   : > { %s768_s12 = sadd.s32 1, %s725_s9   ;;  %s24_s13 = sadd.s32 1, %s721_s8 }
   0x7   : > { %s21_s14 = ssub.s32 %s725_s9, %s768_s12  ;;  %p31_p0 = scmp.ne.s32.totalorder %s721_s8, %s717_s7 }
   0x8   : > { %p22_p1 = scmp.eq.s32.totalorder %s21_s14, 0  ;;  %p32_p2 = scmp.eq.s32.totalorder %s725_s9, 0 }
   0x9   : > { %p37_p3 = scmp.ne.s32.totalorder %s717_s7, %s713_s6  ;;  %p38_p4 = scmp.eq.s32.totalorder %s764_s10, 0 }
   0xa   : > { %s780_s15 = scalar_select %p22_p1, %s721_s8, %s24_s13  }
   0xb   : > { %p33_p5 = por %p32_p2, %p31_p0  ;;  %p782_p6 = por %p38_p4, %p37_p3 }
   0xc   : > { %p61_p7 = scmp.eq.s32.totalorder %s764_s10, 3  ;;  %p67_p8 = scmp.eq.s32.totalorder %s500_s11, 3 }
   0xd   : > { %p502_p11 = scmp.ge.s32.totalorder %s725_s9, 4 }
   0xe   : > { %p787_p9 = por %p61_p7, %p31_p0  ;;  %p791_p10 = por %p67_p8, %p37_p3 }
   0xf   : > { %83 = sbr.rel (%p502_p11) target bundleno = 57 (0x39), region = 16 }
  0x10   : > { %s1047_s18 = scalar_select %p791_p10, 1, 0 }
  0x16   : > { %86 = sbr.rel (!%p33_p5) target bundleno = 57 (0x39), region = 20  ;;  %s87_s19 = sand.u32 (%p33_p5), 1, %s721_s8  }
  0x17   : > { %s504_s20 = sshll.u32 (%p33_p5), %s725_s9, 6  ;;  %s503_s21 = sshll.u32 (%p33_p5), %s87_s19, 9 }
  0x18   : > { %s93_s22 = ssub.s32 (%p33_p5), 196, %s504_s20  ;;  %s801_s25 = scalar_lea.sflag (%p33_p5), [#allocation3], %s87_s19 }
  0x19   : > { %p94_p12 = scmp.lt.s32.totalorder (%p33_p5), %s93_s22, 64  ;;  %s91_s26 = scalar_lea.vmem (%p33_p5), [#allocation2], %s503_s21 }
  0x1d   : > { %s1054_s22 = smov (!%p94_p12, %s93_s22), 64 }
  0x1e   : > { %s798_s23 = sshll.u32 %s1054_s22, 7 }
  0x1f   : > { %s98_s24 = ssub.s32 8192, %s798_s23 }
  0x20   : > { %99 = vsyncadd %s801_s25, %s98_s24  ;;  %p506_p13 = scmp.ne.s32.totalorder %s798_s23, 0  ;;  %s586_s27 = sshll.u32 %s725_s9, 13 }
  0x21   : > { %s809_s30 = scalar_lea.hbm %s1043_s0, %s586_s27  ;;  %s104_s2 = sshll.u32 %s91_s26, 4  ;;  %s811_s2 = int_to_ptr.vmem [resolvable:$true] %s104_s2 }
  0x22   : > { %s631_s3 = scalar_lea.hbm %s809_s30, %s798_s23  ;;  %s635_s11 = scalar_lea.hbm %s1043_s0, 25088 }
  0x23   : > { %p632_p0 = scmp.ne.s32.totalorder %s809_s30, %s631_s3  ;;  %p636_p3 = scmp.lt.u32.totalorder %s809_s30, %s1043_s0 }
  0x24   : > { %p637_p4 = scmp.lt.u32.totalorder %s635_s11, %s631_s3  ;;  %p639_p7 = scmp.lt.u32.totalorder %s631_s3, %s809_s30 }
  0x25   : > { %p633_p1 = pnand %p632_p0, %p506_p13 }
  0x26   : > { %p638_p5 = por %p637_p4, %p636_p3 }
  0x27   : > { %p634_p2 = pneg %p633_p1 }
  0x28   : > { %p640_p8 = por %p639_p7, %p638_p5 }
  0x2a   : > { %p641_p11 = pnand %p640_p8, %p634_p2 }
  0x2c   : > { %644 = shalt.err (!%p641_p11)
}
  0x2d   : > { %s645_s19 = scalar_lea.vmem %s811_s2, %s798_s23  ;;  %s727_s20 = smov [#allocation2]  }
  0x2e   : > { %p646_p12 = scmp.ne.s32.totalorder %s811_s2, %s645_s19  ;;  %s649_s21 = sshll.u32 %s727_s20, 4  ;;  %s650_s21 = int_to_ptr.vmem [resolvable:$false] %s649_s21 }
  0x2f   : > { %s651_s22 = scalar_lea.vmem %s650_s21, 16384  ;;  %p652_p10 = scmp.lt.s32.totalorder %s811_s2, %s650_s21 }
  0x30   : > { %p647_p0 = pnand %p646_p12, %p506_p13  ;;  %p653_p3 = scmp.lt.s32.totalorder %s651_s22, %s645_s19 }
  0x32   : > { %p648_p1 = pneg %p647_p0  ;;  %p654_p4 = por %p653_p3, %p652_p10 }
  0x34   : > { %p655_p5 = pnand %p654_p4, %p648_p1 }
  0x36   : > { %658 = shalt.err (!%p655_p5)
}
  0x37   : > { %s728_s24 = smov 128   ;;  %s729_s26 = smov 8  }
  0x38   : > { %110 = dma.hbm_to_vmem [thread:$0]  (%p506_p13), %s809_s30, %s798_s23, %s811_s2, %s801_s25, %s728_s24, %s728_s24, %s729_s26  }
  0x39 PF: > { %p510_p2 = scmp.ge.s32.totalorder %s725_s9, 1  ;;  %p112_p7 = scmp.lt.s32.totalorder %s725_s9, 5 }
  0x3b   : > { %p113_p8 = pnand %p510_p2, %p112_p7 }
  0x3c   : > { %s841_s27 = sand.u32 (!%p113_p8), 1, %s717_s7  }
  0x3d   : > { %116 = sbr.rel (%p113_p8) target bundleno = 135 (0x87), region = 24  ;;  %s511_s28 = sshll.u32 (!%p113_p8), %s841_s27, 9 }
  0x3e   : > { %s119_s29 = scalar_lea.sflag (!%p113_p8), [#allocation3], %s841_s27  ;;  %s845_s3 = scalar_lea.vmem (!%p113_p8), [#allocation2], %s511_s28 }
  0x44   : > { %704 = dma.done.wait (%p782_p6), %s119_s29, 8192  }
  0x45   : > { %706 = vsyncadd (%p782_p6), %s119_s29, 4294959104  ;;  %v151_v0 = vld [vmem:[%s845_s3] sm:$0xff]  ;;  %v152_v1 = vld [vmem:[%s845_s3 + $0x8] sm:$0xff]  ;;  %s860_s16 = scalar_lea.vmem [#allocation5], %s511_s28  ;;  %s408_s23 = scalar_lea.sflag [#allocation4], %s841_s27 }
  0x46   : > { %v153_v2 = vld [vmem:[%s845_s3 + $0x10] sm:$0xff]  ;;  %v513_v3 = vclamps-f32 %v151_v0, 1.0  ;;  %v514_v4 = vclamps-f32 %v152_v1, 1.0  ;;  %v154_v6 = vld [vmem:[%s845_s3 + $0x18] sm:$0xff]  ;;  %v155_v7 = vld [vmem:[%s845_s3 + $0x20] sm:$0xff]  ;;  %s578_s25 = sshll.u32 (%p787_p9), %s764_s10, 6 }
  0x47   : > { %v515_v5 = vclamps-f32 %v153_v2, 1.0  ;;  %v156_v8 = vld [vmem:[%s845_s3 + $0x28] sm:$0xff]  ;;  %v516_v9 = vclamps-f32 %v154_v6, 1.0  ;;  %v517_v10 = vclamps-f32 %v155_v7, 1.0  ;;  %v157_v12 = vld [vmem:[%s845_s3 + $0x30] sm:$0xff]  ;;  %v158_v13 = vld [vmem:[%s845_s3 + $0x38] sm:$0xff] }
  0x48   : > { %v518_v11 = vclamps-f32 %v156_v8, 1.0  ;;  %v159_v14 = vld [vmem:[%s845_s3 + $0x40] sm:$0xff]  ;;  %343 = vst [vmem:[%s860_s16] sm:$0xff] %v513_v3  ;;  %344 = vst [vmem:[%s860_s16 + $0x8] sm:$0xff] %v514_v4  ;;  %v519_v15 = vclamps-f32 %v157_v12, 1.0  ;;  %v520_v16 = vclamps-f32 %v158_v13, 1.0  ;;  %v160_v18 = vld [vmem:[%s845_s3 + $0x48] sm:$0xff] }
  0x49   : > { %345 = vst [vmem:[%s860_s16 + $0x10] sm:$0xff] %v515_v5  ;;  %v521_v17 = vclamps-f32 %v159_v14, 1.0  ;;  %v161_v19 = vld [vmem:[%s845_s3 + $0x50] sm:$0xff]  ;;  %v162_v20 = vld [vmem:[%s845_s3 + $0x58] sm:$0xff]  ;;  %346 = vst [vmem:[%s860_s16 + $0x18] sm:$0xff] %v516_v9  ;;  %v522_v21 = vclamps-f32 %v160_v18, 1.0 }
  0x4a   : > { %347 = vst [vmem:[%s860_s16 + $0x20] sm:$0xff] %v517_v10  ;;  %348 = vst [vmem:[%s860_s16 + $0x28] sm:$0xff] %v518_v11  ;;  %v523_v22 = vclamps-f32 %v161_v19, 1.0  ;;  %v524_v23 = vclamps-f32 %v162_v20, 1.0  ;;  %v163_v24 = vld [vmem:[%s845_s3 + $0x60] sm:$0xff]  ;;  %v164_v25 = vld [vmem:[%s845_s3 + $0x68] sm:$0xff] }
  0x4b   : > { %v165_v26 = vld [vmem:[%s845_s3 + $0x70] sm:$0xff]  ;;  %349 = vst [vmem:[%s860_s16 + $0x30] sm:$0xff] %v519_v15  ;;  %350 = vst [vmem:[%s860_s16 + $0x38] sm:$0xff] %v520_v16  ;;  %v525_v27 = vclamps-f32 %v163_v24, 1.0  ;;  %v526_v28 = vclamps-f32 %v164_v25, 1.0  ;;  %v166_v30 = vld [vmem:[%s845_s3 + $0x78] sm:$0xff] }
  0x4c   : > { %351 = vst [vmem:[%s860_s16 + $0x40] sm:$0xff] %v521_v17  ;;  %v527_v29 = vclamps-f32 %v165_v26, 1.0  ;;  %v167_v31 = vld [vmem:[%s845_s3 + $0x80] sm:$0xff]  ;;  %v168_v32 = vld [vmem:[%s845_s3 + $0x88] sm:$0xff]  ;;  %352 = vst [vmem:[%s860_s16 + $0x48] sm:$0xff] %v522_v21  ;;  %v528_v33 = vclamps-f32 %v166_v30, 1.0 }
  0x4d   : > { %353 = vst [vmem:[%s860_s16 + $0x50] sm:$0xff] %v523_v22  ;;  %354 = vst [vmem:[%s860_s16 + $0x58] sm:$0xff] %v524_v23  ;;  %v529_v34 = vclamps-f32 %v167_v31, 1.0  ;;  %v530_v35 = vclamps-f32 %v168_v32, 1.0  ;;  %v169_v36 = vld [vmem:[%s845_s3 + $0x90] sm:$0xff]  ;;  %v170_v37 = vld [vmem:[%s845_s3 + $0x98] sm:$0xff] }
  0x4e   : > { %v171_v38 = vld [vmem:[%s845_s3 + $0xa0] sm:$0xff]  ;;  %355 = vst [vmem:[%s860_s16 + $0x60] sm:$0xff] %v525_v27  ;;  %356 = vst [vmem:[%s860_s16 + $0x68] sm:$0xff] %v526_v28  ;;  %v531_v39 = vclamps-f32 %v169_v36, 1.0  ;;  %v532_v40 = vclamps-f32 %v170_v37, 1.0  ;;  %v172_v42 = vld [vmem:[%s845_s3 + $0xa8] sm:$0xff] }
  0x4f   : > { %357 = vst [vmem:[%s860_s16 + $0x70] sm:$0xff] %v527_v29  ;;  %v533_v41 = vclamps-f32 %v171_v38, 1.0  ;;  %v173_v43 = vld [vmem:[%s845_s3 + $0xb0] sm:$0xff]  ;;  %v174_v44 = vld [vmem:[%s845_s3 + $0xb8] sm:$0xff]  ;;  %358 = vst [vmem:[%s860_s16 + $0x78] sm:$0xff] %v528_v33  ;;  %v534_v45 = vclamps-f32 %v172_v42, 1.0 }
  0x50   : > { %359 = vst [vmem:[%s860_s16 + $0x80] sm:$0xff] %v529_v34  ;;  %360 = vst [vmem:[%s860_s16 + $0x88] sm:$0xff] %v530_v35  ;;  %v535_v46 = vclamps-f32 %v173_v43, 1.0  ;;  %v536_v47 = vclamps-f32 %v174_v44, 1.0  ;;  %v175_v48 = vld [vmem:[%s845_s3 + $0xc0] sm:$0xff]  ;;  %v176_v49 = vld [vmem:[%s845_s3 + $0xc8] sm:$0xff] }
  0x51   : > { %v177_v50 = vld [vmem:[%s845_s3 + $0xd0] sm:$0xff]  ;;  %361 = vst [vmem:[%s860_s16 + $0x90] sm:$0xff] %v531_v39  ;;  %362 = vst [vmem:[%s860_s16 + $0x98] sm:$0xff] %v532_v40  ;;  %v537_v51 = vclamps-f32 %v175_v48, 1.0  ;;  %v538_v52 = vclamps-f32 %v176_v49, 1.0  ;;  %v178_v54 = vld [vmem:[%s845_s3 + $0xd8] sm:$0xff] }
  0x52   : > { %363 = vst [vmem:[%s860_s16 + $0xa0] sm:$0xff] %v533_v41  ;;  %v539_v53 = vclamps-f32 %v177_v50, 1.0  ;;  %v179_v55 = vld [vmem:[%s845_s3 + $0xe0] sm:$0xff]  ;;  %v180_v56 = vld [vmem:[%s845_s3 + $0xe8] sm:$0xff]  ;;  %364 = vst [vmem:[%s860_s16 + $0xa8] sm:$0xff] %v534_v45  ;;  %v540_v57 = vclamps-f32 %v178_v54, 1.0 }
  0x53   : > { %365 = vst [vmem:[%s860_s16 + $0xb0] sm:$0xff] %v535_v46  ;;  %366 = vst [vmem:[%s860_s16 + $0xb8] sm:$0xff] %v536_v47  ;;  %v541_v58 = vclamps-f32 %v179_v55, 1.0  ;;  %v542_v59 = vclamps-f32 %v180_v56, 1.0  ;;  %v181_v60 = vld [vmem:[%s845_s3 + $0xf0] sm:$0xff]  ;;  %v182_v61 = vld [vmem:[%s845_s3 + $0xf8] sm:$0xff] }
  0x54   : > { %v183_v62 = vld [vmem:[%s845_s3 + $0x100] sm:$0xff]  ;;  %367 = vst [vmem:[%s860_s16 + $0xc0] sm:$0xff] %v537_v51  ;;  %368 = vst [vmem:[%s860_s16 + $0xc8] sm:$0xff] %v538_v52  ;;  %v543_v63 = vclamps-f32 %v181_v60, 1.0  ;;  %v544_v0 = vclamps-f32 %v182_v61, 1.0  ;;  %v184_v2 = vld [vmem:[%s845_s3 + $0x108] sm:$0xff] }
  0x55   : > { %369 = vst [vmem:[%s860_s16 + $0xd0] sm:$0xff] %v539_v53  ;;  %v545_v1 = vclamps-f32 %v183_v62, 1.0  ;;  %v185_v3 = vld [vmem:[%s845_s3 + $0x110] sm:$0xff]  ;;  %v186_v4 = vld [vmem:[%s845_s3 + $0x118] sm:$0xff]  ;;  %370 = vst [vmem:[%s860_s16 + $0xd8] sm:$0xff] %v540_v57  ;;  %v546_v5 = vclamps-f32 %v184_v2, 1.0 }
  0x56   : > { %371 = vst [vmem:[%s860_s16 + $0xe0] sm:$0xff] %v541_v58  ;;  %372 = vst [vmem:[%s860_s16 + $0xe8] sm:$0xff] %v542_v59  ;;  %v547_v6 = vclamps-f32 %v185_v3, 1.0  ;;  %v548_v7 = vclamps-f32 %v186_v4, 1.0  ;;  %v187_v8 = vld [vmem:[%s845_s3 + $0x120] sm:$0xff]  ;;  %v188_v9 = vld [vmem:[%s845_s3 + $0x128] sm:$0xff] }
  0x57   : > { %v189_v10 = vld [vmem:[%s845_s3 + $0x130] sm:$0xff]  ;;  %373 = vst [vmem:[%s860_s16 + $0xf0] sm:$0xff] %v543_v63  ;;  %374 = vst [vmem:[%s860_s16 + $0xf8] sm:$0xff] %v544_v0  ;;  %v549_v11 = vclamps-f32 %v187_v8, 1.0  ;;  %v550_v12 = vclamps-f32 %v188_v9, 1.0  ;;  %v190_v14 = vld [vmem:[%s845_s3 + $0x138] sm:$0xff] }
  0x58   : > { %375 = vst [vmem:[%s860_s16 + $0x100] sm:$0xff] %v545_v1  ;;  %v551_v13 = vclamps-f32 %v189_v10, 1.0  ;;  %v191_v15 = vld [vmem:[%s845_s3 + $0x140] sm:$0xff]  ;;  %v192_v16 = vld [vmem:[%s845_s3 + $0x148] sm:$0xff]  ;;  %376 = vst [vmem:[%s860_s16 + $0x108] sm:$0xff] %v546_v5  ;;  %v552_v17 = vclamps-f32 %v190_v14, 1.0 }
  0x59   : > { %377 = vst [vmem:[%s860_s16 + $0x110] sm:$0xff] %v547_v6  ;;  %378 = vst [vmem:[%s860_s16 + $0x118] sm:$0xff] %v548_v7  ;;  %v553_v18 = vclamps-f32 %v191_v15, 1.0  ;;  %v554_v19 = vclamps-f32 %v192_v16, 1.0  ;;  %v193_v20 = vld [vmem:[%s845_s3 + $0x150] sm:$0xff]  ;;  %v194_v21 = vld [vmem:[%s845_s3 + $0x158] sm:$0xff] }
  0x5a   : > { %v195_v22 = vld [vmem:[%s845_s3 + $0x160] sm:$0xff]  ;;  %379 = vst [vmem:[%s860_s16 + $0x120] sm:$0xff] %v549_v11  ;;  %380 = vst [vmem:[%s860_s16 + $0x128] sm:$0xff] %v550_v12  ;;  %v555_v23 = vclamps-f32 %v193_v20, 1.0  ;;  %v556_v24 = vclamps-f32 %v194_v21, 1.0  ;;  %v196_v26 = vld [vmem:[%s845_s3 + $0x168] sm:$0xff] }
  0x5b   : > { %381 = vst [vmem:[%s860_s16 + $0x130] sm:$0xff] %v551_v13  ;;  %v557_v25 = vclamps-f32 %v195_v22, 1.0  ;;  %v197_v27 = vld [vmem:[%s845_s3 + $0x170] sm:$0xff]  ;;  %v198_v28 = vld [vmem:[%s845_s3 + $0x178] sm:$0xff]  ;;  %382 = vst [vmem:[%s860_s16 + $0x138] sm:$0xff] %v552_v17  ;;  %v558_v29 = vclamps-f32 %v196_v26, 1.0 }
  0x5c   : > { %383 = vst [vmem:[%s860_s16 + $0x140] sm:$0xff] %v553_v18  ;;  %384 = vst [vmem:[%s860_s16 + $0x148] sm:$0xff] %v554_v19  ;;  %v559_v30 = vclamps-f32 %v197_v27, 1.0  ;;  %v560_v31 = vclamps-f32 %v198_v28, 1.0  ;;  %v199_v32 = vld [vmem:[%s845_s3 + $0x180] sm:$0xff]  ;;  %v200_v33 = vld [vmem:[%s845_s3 + $0x188] sm:$0xff] }
  0x5d   : > { %v201_v34 = vld [vmem:[%s845_s3 + $0x190] sm:$0xff]  ;;  %385 = vst [vmem:[%s860_s16 + $0x150] sm:$0xff] %v555_v23  ;;  %386 = vst [vmem:[%s860_s16 + $0x158] sm:$0xff] %v556_v24  ;;  %v561_v35 = vclamps-f32 %v199_v32, 1.0  ;;  %v562_v36 = vclamps-f32 %v200_v33, 1.0  ;;  %v202_v38 = vld [vmem:[%s845_s3 + $0x198] sm:$0xff] }
  0x5e   : > { %387 = vst [vmem:[%s860_s16 + $0x160] sm:$0xff] %v557_v25  ;;  %v563_v37 = vclamps-f32 %v201_v34, 1.0  ;;  %v203_v39 = vld [vmem:[%s845_s3 + $0x1a0] sm:$0xff]  ;;  %v204_v40 = vld [vmem:[%s845_s3 + $0x1a8] sm:$0xff]  ;;  %388 = vst [vmem:[%s860_s16 + $0x168] sm:$0xff] %v558_v29  ;;  %v564_v41 = vclamps-f32 %v202_v38, 1.0 }
  0x5f   : > { %389 = vst [vmem:[%s860_s16 + $0x170] sm:$0xff] %v559_v30  ;;  %390 = vst [vmem:[%s860_s16 + $0x178] sm:$0xff] %v560_v31  ;;  %v565_v42 = vclamps-f32 %v203_v39, 1.0  ;;  %v566_v43 = vclamps-f32 %v204_v40, 1.0  ;;  %v205_v44 = vld [vmem:[%s845_s3 + $0x1b0] sm:$0xff]  ;;  %v206_v45 = vld [vmem:[%s845_s3 + $0x1b8] sm:$0xff] }
  0x60   : > { %v207_v46 = vld [vmem:[%s845_s3 + $0x1c0] sm:$0xff]  ;;  %391 = vst [vmem:[%s860_s16 + $0x180] sm:$0xff] %v561_v35  ;;  %392 = vst [vmem:[%s860_s16 + $0x188] sm:$0xff] %v562_v36  ;;  %v567_v47 = vclamps-f32 %v205_v44, 1.0  ;;  %v568_v48 = vclamps-f32 %v206_v45, 1.0  ;;  %v208_v50 = vld [vmem:[%s845_s3 + $0x1c8] sm:$0xff] }
  0x61   : > { %393 = vst [vmem:[%s860_s16 + $0x190] sm:$0xff] %v563_v37  ;;  %v569_v49 = vclamps-f32 %v207_v46, 1.0  ;;  %v209_v51 = vld [vmem:[%s845_s3 + $0x1d0] sm:$0xff]  ;;  %v210_v52 = vld [vmem:[%s845_s3 + $0x1d8] sm:$0xff]  ;;  %394 = vst [vmem:[%s860_s16 + $0x198] sm:$0xff] %v564_v41  ;;  %v570_v53 = vclamps-f32 %v208_v50, 1.0 }
  0x62   : > { %395 = vst [vmem:[%s860_s16 + $0x1a0] sm:$0xff] %v565_v42  ;;  %396 = vst [vmem:[%s860_s16 + $0x1a8] sm:$0xff] %v566_v43  ;;  %v571_v54 = vclamps-f32 %v209_v51, 1.0  ;;  %v572_v55 = vclamps-f32 %v210_v52, 1.0  ;;  %v211_v56 = vld [vmem:[%s845_s3 + $0x1e0] sm:$0xff]  ;;  %v212_v57 = vld [vmem:[%s845_s3 + $0x1e8] sm:$0xff] }
  0x63   : > { %v213_v58 = vld [vmem:[%s845_s3 + $0x1f0] sm:$0xff]  ;;  %397 = vst [vmem:[%s860_s16 + $0x1b0] sm:$0xff] %v567_v47  ;;  %398 = vst [vmem:[%s860_s16 + $0x1b8] sm:$0xff] %v568_v48  ;;  %v573_v59 = vclamps-f32 %v211_v56, 1.0  ;;  %v574_v60 = vclamps-f32 %v212_v57, 1.0  ;;  %v214_v62 = vld [vmem:[%s845_s3 + $0x1f8] sm:$0xff] }
  0x64   : > { %399 = vst [vmem:[%s860_s16 + $0x1c0] sm:$0xff] %v569_v49  ;;  %v575_v61 = vclamps-f32 %v213_v58, 1.0  ;;  %400 = vst [vmem:[%s860_s16 + $0x1c8] sm:$0xff] %v570_v53  ;;  %v576_v63 = vclamps-f32 %v214_v62, 1.0  ;;  %414 = sbr.rel (!%p787_p9) target bundleno = 135 (0x87), region = 32  ;;  %s416_s30 = ssub.s32 (%p787_p9), 196, %s578_s25 }
  0x65   : > { %401 = vst [vmem:[%s860_s16 + $0x1d0] sm:$0xff] %v571_v54  ;;  %402 = vst [vmem:[%s860_s16 + $0x1d8] sm:$0xff] %v572_v55  ;;  %p417_p6 = scmp.lt.s32.totalorder (%p787_p9), %s416_s30, 64 }
  0x66   : > { %403 = vst [vmem:[%s860_s16 + $0x1e0] sm:$0xff] %v573_v59  ;;  %404 = vst [vmem:[%s860_s16 + $0x1e8] sm:$0xff] %v574_v60 }
  0x67   : > { %405 = vst [vmem:[%s860_s16 + $0x1f0] sm:$0xff] %v575_v61  ;;  %406 = vst [vmem:[%s860_s16 + $0x1f8] sm:$0xff] %v576_v63 }
  0x6b   : > { %s1056_s30 = smov (!%p417_p6, %s416_s30), 64 }
  0x6c   : > { %s985_s2 = sshll.u32 %s1056_s30, 7 }
  0x6d   : > { %s421_s4 = ssub.s32 8192, %s985_s2 }
  0x6e   : > { %422 = vsyncadd %s408_s23, %s421_s4  ;;  %p580_p10 = scmp.ne.s32.totalorder %s985_s2, 0  ;;  %s587_s17 = sshll.u32 %s764_s10, 13 }
  0x6f   : > { %s995_s13 = scalar_lea.hbm %s1044_s1, %s587_s17  ;;  %s427_s14 = sshll.u32 %s860_s16, 4  ;;  %s998_s14 = int_to_ptr.vmem [resolvable:$true] %s427_s14 }
  0x70   : > { %s659_s19 = scalar_lea.vmem %s998_s14, %s985_s2  ;;  %s730_s20 = smov [#allocation5]  }
  0x71   : > { %p660_p9 = scmp.ne.s32.totalorder %s998_s14, %s659_s19  ;;  %s663_s21 = sshll.u32 %s730_s20, 4  ;;  %s664_s21 = int_to_ptr.vmem [resolvable:$false] %s663_s21 }
  0x72   : > { %s665_s10 = scalar_lea.vmem %s664_s21, 16384  ;;  %p666_p12 = scmp.lt.s32.totalorder %s998_s14, %s664_s21 }
  0x73   : > { %p661_p13 = pnand %p660_p9, %p580_p10  ;;  %p667_p0 = scmp.lt.s32.totalorder %s665_s10, %s659_s19 }
  0x75   : > { %p662_p11 = pneg %p661_p13  ;;  %p668_p1 = por %p667_p0, %p666_p12 }
  0x77   : > { %p669_p3 = pnand %p668_p1, %p662_p11 }
  0x79   : > { %672 = shalt.err (!%p669_p3)
}
  0x7a   : > { %s673_s22 = scalar_lea.hbm %s995_s13, %s985_s2  ;;  %s677_s28 = scalar_lea.hbm %s1044_s1, 25088 }
  0x7b   : > { %p674_p4 = scmp.ne.s32.totalorder %s995_s13, %s673_s22  ;;  %p678_p7 = scmp.lt.u32.totalorder %s995_s13, %s1044_s1 }
  0x7c   : > { %p679_p8 = scmp.lt.u32.totalorder %s677_s28, %s673_s22  ;;  %p681_p9 = scmp.lt.u32.totalorder %s673_s22, %s995_s13 }
  0x7d   : > { %p675_p5 = pnand %p674_p4, %p580_p10 }
  0x7e   : > { %p680_p6 = por %p679_p8, %p678_p7 }
  0x7f   : > { %p676_p2 = pneg %p675_p5 }
  0x80   : > { %p682_p13 = por %p681_p9, %p680_p6 }
  0x82   : > { %p683_p11 = pnand %p682_p13, %p676_p2 }
  0x84   : > { %686 = shalt.err (!%p683_p11)
}
  0x85   : > { %s731_s16 = smov 128   ;;  %s732_s25 = smov 8  }
  0x86   : > { %433 = dma.vmem_to_hbm [thread:$0]  (%p580_p10), %s998_s14, %s985_s2, %s995_s13, %s408_s23, %s731_s16, %s731_s16, %s732_s25  }
  0x87 PF: > { %p594_p12 = scmp.ge.s32.totalorder %s725_s9, 2  ;;  %s442_s30 = sand.u32 1, %s713_s6  }
  0x88   : > { %p1048_p0 = scmp.ne.s32.totalorder %s1047_s18, 0  ;;  %s443_s4 = scalar_lea.sflag [#allocation4], %s442_s30 }
  0x8a   : > { %p591_p1 = pnand %p594_p12, %p1048_p0 }
  0x8c   : > { %708 = dma.done.wait (!%p591_p1), %s443_s4, 8192  }
  0x8d   : > { %710 = vsyncadd (!%p591_p1), %s443_s4, 4294959104  ;;  %p14_p3 = scmp.ge.s32.totalorder %s768_s12, 6   ;;  %s1049_s6 = smov %s717_s7 }
  0x8e   : > { %s1050_s7 = smov %s721_s8  ;;  %s1051_s8 = smov %s780_s15 }
  0x8f   : > { %s1052_s9 = smov %s768_s12  ;;  %16 = sbr.rel (!%p14_p3) target bundleno = 5 (0x5), region = 69 }
  0x96   :  { %448 = vsyncpa [#allocation3], 1 }
  0x97   :  { %450 = vsyncpa [#allocation3 + $0x1], 1 }
  0x98   :  { %451 = vsyncpa [#allocation4], 1 }
  0x99   :  { %453 = vsyncpa [#allocation4 + $0x1], 1 }

</bundles_post_ra>
